<compile_context>
chip_gen: v6e
topology: v6e:2x2x1
jax: 0.10.0
libtpu: 0.0.40
codegen_flags: <defaults>
</compile_context>

<pallas_src>
import functools
import math

import jax
import jax.numpy as jnp
from jax import lax
from jax.experimental import pallas as pl
from jax.experimental.pallas import tpu as pltpu


def _round_up(v: int, m: int) -> int:
    return (v + m - 1) // m * m


def _device_kind() -> str:
    try:
        return jax.devices()[0].device_kind.lower()
    except Exception:  # pragma: no cover - no device available
        return ""


def _gcn_kernel(x_ref, adj_ref, w_ref, b_ref, o_ref, *,
                a_first, add_identity, n_valid, n_pad, mm_dtype):
    x = x_ref[...]                                    # (G, Np, Finp)  f32
    adj = adj_ref[...]                                # (G, Np, Np)    mm_dtype
    w = w_ref[...]                                    # (Finp, Foutp)  f32
    g, n_p, _ = x.shape
    fout_p = w.shape[1]

    # Row degrees of A(+I).  Accumulate in f32 even when adj is bf16.
    deg = jnp.sum(adj.astype(jnp.float32), axis=2, keepdims=True)   # (G, Np, 1)
    if add_identity:
        deg = deg + 1.0
    if n_valid < n_pad:
        # Padded nodes are disconnected and their features are zero; force
        # their degree to 1 so rsqrt stays finite (no NaN contamination).
        row_ids = lax.broadcasted_iota(jnp.int32, (1, n_pad, 1), 1)
        deg = jnp.where(row_ids < n_valid, deg, 1.0)
    s = lax.rsqrt(deg)                                # (G, Np, 1)  EUP rsqrt
    inv_deg = s * s                                   # == 1/deg, no divide

    def mm_shared(lhs):
        # (G, Np, K) @ (K, Foutp) on the MXU via a 2-D matmul.
        flat = lhs.reshape(g * n_p, lhs.shape[-1])
        return jnp.dot(flat, w, preferred_element_type=jnp.float32).reshape(
            g, n_p, fout_p)

    if a_first:
        # (D^-1/2 (A+I) D^-1/2) @ X folded into row scalings, then @ W.
        inner = (s * x).astype(mm_dtype)
        agg = s * jnp.einsum("gij,gjk->gik", adj, inner,
                             preferred_element_type=jnp.float32)
        if add_identity:
            agg = agg + x * inv_deg
        out = mm_shared(agg)
    else:
        # X @ W first, then the normalized aggregation.
        support = mm_shared(x)                        # (G, Np, Foutp) f32
        inner = (s * support).astype(mm_dtype)
        out = s * jnp.einsum("gij,gjf->gif", adj, inner,
                             preferred_element_type=jnp.float32)
        if add_identity:
            out = out + support * inv_deg

    o_ref[...] = out + b_ref[...]                     # bias broadcast over nodes


@functools.partial(jax.jit,
                   static_argnames=("add_identity", "adj_dtype",
                                    "graphs_per_step"))
def gcn_forward_batched(x, adj, weight, bias=None, *, add_identity=True,
                        adj_dtype=jnp.bfloat16, graphs_per_step=None):
    """Batched GCN forward.

    x:(B,N,Fin)  adj:(B,N,N)  weight:(Fin,Fout)  bias:(Fout,) or None.
    adj_dtype: dtype fed to the N^2 MXU matmul (bf16 default; f32 for exact).
    """
    x = jnp.asarray(x, jnp.float32)
    adj = jnp.asarray(adj)
    weight = jnp.asarray(weight, jnp.float32)
    b, n, fin = x.shape
    fout = weight.shape[1]
    if bias is None:
        bias = jnp.zeros((fout,), jnp.float32)
    bias = jnp.asarray(bias, jnp.float32).reshape(1, fout)
    adj_dtype = jnp.dtype(adj_dtype)

    kind = _device_kind()
    mxu_n = 128 if any(k in kind for k in ("v2", "v3", "v4", "v5")) else 256
    if "v7" in kind:
        vmem_limit = 48 * 1024 * 1024          # v7x: 64 MiB physical per TC
    elif any(k in kind for k in ("v4", "v5", "v6")):
        vmem_limit = 100 * 1024 * 1024         # 128 MiB physical
    else:
        vmem_limit = None

    # Lane/sublane alignment: N is both the adj lane dim and the MXU
    # contraction dim; Fin/Fout are contraction/output lane dims.
    n_p = _round_up(n, 128)
    fin_p = _round_up(fin, 128)
    fout_p = _round_up(fout, 128)

    # Graphs per grid step: amortize per-step pipeline overhead for tiny
    # graphs while leaving VMEM headroom for double buffering.
    per_graph = n_p * n_p * adj_dtype.itemsize + n_p * (fin_p + fout_p) * 4
    if graphs_per_step is None:
        budget = (vmem_limit or 32 * 1024 * 1024) // 6
        graphs_per_step = max(1, min(b, budget // max(per_graph, 1)))
    g = int(graphs_per_step)
    b_p = _round_up(b, g)

    # Single fused pad (+ bf16 cast) pass over adj; skipped when aligned.
    if adj.dtype != adj_dtype:
        adj = adj.astype(adj_dtype)
    if (b_p, n_p) != (b, n):
        adj = jnp.pad(adj, ((0, b_p - b), (0, n_p - n), (0, n_p - n)))
    if (b_p, n_p, fin_p) != (b, n, fin):
        x = jnp.pad(x, ((0, b_p - b), (0, n_p - n), (0, fin_p - fin)))
    if (fin_p, fout_p) != (fin, fout):
        weight = jnp.pad(weight, ((0, fin_p - fin), (0, fout_p - fout)))
    if fout_p != fout:
        bias = jnp.pad(bias, ((0, 0), (0, fout_p - fout)))

    # Run the N^2 matmul with the fewer-MXU-pass feature dim on the inside;
    # on ties prefer support-first (avoids the extra (N,Fin) correction term).
    a_first = (-(-fin_p // mxu_n)) < (-(-fout_p // mxu_n))

    kernel = functools.partial(
        _gcn_kernel, a_first=a_first, add_identity=add_identity,
        n_valid=n, n_pad=n_p, mm_dtype=adj_dtype)

    out = pl.pallas_call(
        kernel,
        out_shape=jax.ShapeDtypeStruct((b_p, n_p, fout_p), jnp.float32),
        grid=(b_p // g,),
        in_specs=[
            pl.BlockSpec((g, n_p, fin_p), lambda i: (i, 0, 0)),
            pl.BlockSpec((g, n_p, n_p), lambda i: (i, 0, 0)),
            pl.BlockSpec((fin_p, fout_p), lambda i: (0, 0)),
            pl.BlockSpec((1, fout_p), lambda i: (0, 0)),
        ],
        out_specs=pl.BlockSpec((g, n_p, fout_p), lambda i: (i, 0, 0)),
        compiler_params=pltpu.CompilerParams(
            dimension_semantics=("parallel",),
            vmem_limit_bytes=vmem_limit,
        ),
    )(x, adj, weight, bias)

    return out[:b, :n, :fout]


def gcn_forward(x, adj, weight, bias=None, add_identity=True,
                adj_dtype=jnp.bfloat16):
    """Single-graph module forward. x:(N,Fin) adj:(N,N) weight:(Fin,Fout)."""
    return gcn_forward_batched(x[None], adj[None], weight, bias,
                               add_identity=add_identity,
                               adj_dtype=adj_dtype)[0]


def gcn_reference(x, adj, weight, bias, add_identity=True):
    """Pure-JAX reference matching the PyTorch forward exactly."""
    n = x.shape[0]
    if add_identity:
        adj = adj + jnp.eye(n, dtype=adj.dtype)
    d_inv_sqrt = 1.0 / jnp.sqrt(jnp.sum(adj, axis=1))
    adj_norm = jnp.diag(d_inv_sqrt) @ adj @ jnp.diag(d_inv_sqrt)
    support = x @ weight
    out = adj_norm @ support
    return out + bias if bias is not None else out


if __name__ == "__main__":
    # Module hyperparameters (small, consistent with the forward signature).
    node_num = 8
    in_features = 32
    out_features = 16
    batch = 4

    key = jax.random.PRNGKey(0)
    k_x, k_adj, k_w, k_b = jax.random.split(key, 4)

    # Inputs: node features + symmetric non-negative adjacency (batched).
    xb = jax.random.normal(k_x, (batch, node_num, in_features), dtype=jnp.float32)
    a_raw = jax.random.uniform(k_adj, (batch, node_num, node_num),
                               dtype=jnp.float32)
    adjb = 0.5 * (a_raw + jnp.swapaxes(a_raw, -1, -2))   # symmetric, in [0,1]

    # Deterministic parameter init mirroring reset_parameters():
    stdv = 1.0 / math.sqrt(out_features)
    weight = jax.random.uniform(k_w, (in_features, out_features),
                                dtype=jnp.float32, minval=-stdv, maxval=stdv)
    bias = jax.random.uniform(k_b, (out_features,), dtype=jnp.float32,
                              minval=-stdv, maxval=stdv)

    refb = jax.vmap(lambda xx, aa: gcn_reference(xx, aa, weight, bias))(xb, adjb)

    # Exact-precision path (f32 adjacency feed) -> tight tolerance.
    out_f32 = gcn_forward_batched(xb, adjb, weight, bias,
                                  adj_dtype=jnp.float32)
    out_f32 = jax.block_until_ready(out_f32)
    assert out_f32.shape == (batch, node_num, out_features)
    assert jnp.allclose(out_f32, refb, atol=1e-5, rtol=1e-4), "f32 path mismatch"

    # Default fast path (bf16 adjacency feed) -> bf16-level tolerance.
    out_bf = gcn_forward_batched(xb, adjb, weight, bias)
    out_bf = jax.block_until_ready(out_bf)
    assert out_bf.shape == (batch, node_num, out_features)
    assert jnp.allclose(out_bf, refb, atol=2e-2, rtol=2e-2), "bf16 path mismatch"

    # Single-graph module forward (exact module signature).
    out1 = gcn_forward(xb[0], adjb[0], weight, bias)
    out1 = jax.block_until_ready(out1)
    ref1 = gcn_reference(xb[0], adjb[0], weight, bias)
    assert out1.shape == (node_num, out_features)
    assert jnp.allclose(out1, ref1, atol=2e-2, rtol=2e-2), "single-graph mismatch"

    print("KERNEL_OK")
</pallas_src>

<mosaic_0001>
module attributes {stable_mosaic.version = 11 : i64} {
  func.func @_gcn_kernel(%arg0: i32, %arg1: memref<4x128x128xf32, #tpu.memory_space<vmem>>, %arg2: memref<4x128x128xf32, #tpu.memory_space<vmem>>, %arg3: memref<128x128xf32, #tpu.memory_space<vmem>>, %arg4: memref<1x128xf32, #tpu.memory_space<vmem>>, %arg5: memref<4x128x128xf32, #tpu.memory_space<vmem>>) attributes {dimension_semantics = [#tpu.dimension_semantics<parallel>], iteration_bounds = array<i64: 1>, scalar_prefetch = 0 : i64, scratch_operands = 0 : i64, tpu.core_type = #tpu.core_type<tc>, window_params = [{transform_indices = @transform_0, window_bounds = array<i64: 4, 128, 128>}, {transform_indices = @transform_1, window_bounds = array<i64: 4, 128, 128>}, {pipeline_mode = #tpu.pipeline_mode<synchronous>, transform_indices = @transform_2, window_bounds = array<i64: 128, 128>}, {pipeline_mode = #tpu.pipeline_mode<synchronous>, transform_indices = @transform_3, window_bounds = array<i64: 1, 128>}, {transform_indices = @transform_4, window_bounds = array<i64: 4, 128, 128>}]} {
    %c0 = arith.constant 0 : index
    %c0_0 = arith.constant 0 : index
    %c0_1 = arith.constant 0 : index
    %0 = vector.load %arg1[%c0, %c0_0, %c0_1] : memref<4x128x128xf32, #tpu.memory_space<vmem>>, vector<4x128x128xf32>
    %c0_2 = arith.constant 0 : index
    %c0_3 = arith.constant 0 : index
    %c0_4 = arith.constant 0 : index
    %1 = vector.load %arg2[%c0_2, %c0_3, %c0_4] : memref<4x128x128xf32, #tpu.memory_space<vmem>>, vector<4x128x128xf32>
    %c0_5 = arith.constant 0 : index
    %c0_6 = arith.constant 0 : index
    %2 = vector.load %arg3[%c0_5, %c0_6] : memref<128x128xf32, #tpu.memory_space<vmem>>, vector<128x128xf32>
    %cst = arith.constant dense<0.000000e+00> : vector<4x128xf32>
    %3 = vector.multi_reduction <add>, %1, %cst [2] : vector<4x128x128xf32> to vector<4x128xf32>
    %4 = vector.shape_cast %3 : vector<4x128xf32> to vector<4x128x1xf32>
    %cst_7 = arith.constant 1.000000e+00 : f32
    %5 = vector.broadcast %cst_7 : f32 to vector<4x128x1xf32>
    %6 = arith.addf %4, %5 : vector<4x128x1xf32>
    %7 = tpu.iota {dimensions = array<i32: 1>} : vector<1x128x1xi32>
    %c8_i32 = arith.constant 8 : i32
    %8 = vector.broadcast %c8_i32 : i32 to vector<1x128x1xi32>
    %9 = arith.cmpi slt, %7, %8 : vector<1x128x1xi32>
    %cst_8 = arith.constant 1.000000e+00 : f32
    %10 = vector.shape_cast %9 : vector<1x128x1xi1> to vector<1x128x1xi1>
    %11 = vector.broadcast %10 : vector<1x128x1xi1> to vector<4x128x1xi1>
    %12 = vector.broadcast %cst_8 : f32 to vector<4x128x1xf32>
    %13 = arith.select %11, %6, %12 : vector<4x128x1xi1>, vector<4x128x1xf32>
    %14 = math.rsqrt %13 : vector<4x128x1xf32>
    %15 = arith.mulf %14, %14 : vector<4x128x1xf32>
    %16 = vector.shape_cast %0 : vector<4x128x128xf32> to vector<512x128xf32>
    %cst_9 = arith.constant dense<0.000000e+00> : vector<512x128xf32>
    %17 = tpu.matmul %16, %2, %cst_9 {dimension_numbers = #tpu.dot_dimension_numbers<[1], [0], [0], [1], [0, 0, 1, 1], [], []>} : vector<512x128xf32>, vector<128x128xf32>, vector<512x128xf32> -> vector<512x128xf32>
    %18 = vector.shape_cast %17 : vector<512x128xf32> to vector<4x128x128xf32>
    %19 = vector.broadcast %14 : vector<4x128x1xf32> to vector<4x128x128xf32>
    %20 = arith.mulf %19, %18 : vector<4x128x128xf32>
    "tpu.trace_start"() <{level = 10 : i32, message = "gij,gjf->gif"}> : () -> ()
    %cst_10 = arith.constant dense<0.000000e+00> : vector<4x128x128xf32>
    %21 = tpu.matmul %1, %20, %cst_10 {dimension_numbers = #tpu.dot_dimension_numbers<[2], [1], [1], [2], [0, 0, 0, 1, 1, 2], [0], [0]>} : vector<4x128x128xf32>, vector<4x128x128xf32>, vector<4x128x128xf32> -> vector<4x128x128xf32>
    "tpu.trace_stop"() : () -> ()
    %22 = vector.broadcast %14 : vector<4x128x1xf32> to vector<4x128x128xf32>
    %23 = arith.mulf %22, %21 : vector<4x128x128xf32>
    %24 = vector.broadcast %15 : vector<4x128x1xf32> to vector<4x128x128xf32>
    %25 = arith.mulf %18, %24 : vector<4x128x128xf32>
    %26 = arith.addf %23, %25 : vector<4x128x128xf32>
    %c0_11 = arith.constant 0 : index
    %c0_12 = arith.constant 0 : index
    %27 = vector.load %arg4[%c0_11, %c0_12] : memref<1x128xf32, #tpu.memory_space<vmem>>, vector<1x128xf32>
    %28 = vector.shape_cast %27 : vector<1x128xf32> to vector<1x1x128xf32>
    %29 = vector.broadcast %28 : vector<1x1x128xf32> to vector<4x128x128xf32>
    %30 = arith.addf %26, %29 : vector<4x128x128xf32>
    %c0_13 = arith.constant 0 : index
    %c0_14 = arith.constant 0 : index
    %c0_15 = arith.constant 0 : index
    %31 = vector.load %arg5[%c0_13, %c0_14, %c0_15] : memref<4x128x128xf32, #tpu.memory_space<vmem>>, vector<4x128x128xf32>
    tpu.vector_store %arg5[%c0_13, %c0_14, %c0_15], %30 {strides = array<i32>} : memref<4x128x128xf32, #tpu.memory_space<vmem>>, vector<4x128x128xf32>,
    return
  }
  func.func @transform_0(%arg0: i32) -> (i32, i32, i32) {
    %c0_i32 = arith.constant 0 : i32
    %c0_i32_0 = arith.constant 0 : i32
    %c0_i32_1 = arith.constant 0 : i32
    return %arg0, %c0_i32, %c0_i32_0 : i32, i32, i32
  }
  func.func @transform_1(%arg0: i32) -> (i32, i32, i32) {
    %c0_i32 = arith.constant 0 : i32
    %c0_i32_0 = arith.constant 0 : i32
    %c0_i32_1 = arith.constant 0 : i32
    return %arg0, %c0_i32, %c0_i32_0 : i32, i32, i32
  }
  func.func @transform_2(%arg0: i32) -> (i32, i32) {
    %c0_i32 = arith.constant 0 : i32
    %c0_i32_0 = arith.constant 0 : i32
    %c0_i32_1 = arith.constant 0 : i32
    return %c0_i32, %c0_i32_0 : i32, i32
  }
  func.func @transform_3(%arg0: i32) -> (i32, i32) {
    %c0_i32 = arith.constant 0 : i32
    %c0_i32_0 = arith.constant 0 : i32
    %c0_i32_1 = arith.constant 0 : i32
    return %c0_i32, %c0_i32_0 : i32, i32
  }
  func.func @transform_4(%arg0: i32) -> (i32, i32, i32) {
    %c0_i32 = arith.constant 0 : i32
    %c0_i32_0 = arith.constant 0 : i32
    %c0_i32_1 = arith.constant 0 : i32
    return %arg0, %c0_i32, %c0_i32_0 : i32, i32, i32
  }
}

</mosaic_0001>

<bundles_post_ra>
// kernel: gcn_forward_batched.1
= control target key start
LH: loop header
LB: loop body
LE: loop exit
PB: predicated region body
PF: predicated region fallthrough
CT: control target
= control target key end

     0   :  { %s3609_s2 = inlined_call_operand.vmem [shape: f32[128,128], index: 2, kind: input, shape index: {}]   ;;  %s3610_s0 = inlined_call_operand.vmem [shape: f32[4,128,128], index: 0, kind: input, shape index: {}]   ;;  %s3611_s1 = inlined_call_operand.vmem [shape: f32[4,128,128], index: 1, kind: input, shape index: {}]   ;;  %s3612_s3 = inlined_call_operand.vmem [shape: f32[1,128], index: 3, kind: input, shape index: {}]   ;;  %s3613_s4 = inlined_call_operand.vmem [shape: f32[4,128,128], index: 4, kind: output, shape index: {}]  }
   0x1   :  { %v160_v0 = vld [vmem:[%s3609_s2 + $0x78] sm:$0xff]  ;;  %v159_v1 = vld [vmem:[%s3609_s2 + $0x70] sm:$0xff]  ;;  %v158_v2 = vld [vmem:[%s3609_s2 + $0x68] sm:$0xff] }
   0x2   :  { %2179 = vmatprep.subr.mxu0 %v160_v0  ;;  %v157_v3 = vld [vmem:[%s3609_s2 + $0x60] sm:$0xff]  ;;  %v156_v5 = vld [vmem:[%s3609_s2 + $0x58] sm:$0xff]  ;;  %v155_v6 = vld [vmem:[%s3609_s2 + $0x50] sm:$0xff] }
   0x3   :  { %2180 = vmatpush3.msra.mxu0 %v160_v0  ;;  %v17_v4 = vld [vmem:[%s3610_s0] sm:$0xff]  ;;  %v154_v7 = vld [vmem:[%s3609_s2 + $0x48] sm:$0xff]  ;;  %v152_v10 = vld [vmem:[%s3609_s2 + $0x38] sm:$0xff] }
   0x4   :  { %2181 = vmatprep.subr.mxu0 %v159_v1  ;;  %2211 = vmatprep.mubr.f32.mxu0 %v17_v4  ;;  %v153_v8 = vld [vmem:[%s3609_s2 + $0x40] sm:$0xff]  ;;  %v151_v11 = vld [vmem:[%s3609_s2 + $0x30] sm:$0xff]  ;;  %v150_v13 = vld [vmem:[%s3609_s2 + $0x28] sm:$0xff] }
   0x5   :  { %2182 = vmatpush3.msra.mxu0 %v159_v1  ;;  %v81_v9 = vld [vmem:[%s3611_s1] sm:$0xff]  ;;  %v148_v15 = vld [vmem:[%s3609_s2 + $0x18] sm:$0xff]  ;;  %v147_v17 = vld [vmem:[%s3609_s2 + $0x10] sm:$0xff] }
   0x6   :  { %2183 = vmatprep.subr.mxu0 %v158_v2  ;;  %161 = vadd.xlane.f32.xlu0 %v81_v9  ;;  %v2603_v12 = vld [vmem:[%s3611_s1 + $0x80] sm:$0xff]  ;;  %v146_v18 = vld [vmem:[%s3609_s2 + $0x8] sm:$0xff]  ;;  %v19_v22 = vld [vmem:[%s3610_s0 + $0x10] sm:$0xff] }
   0x7   :  { %2184 = vmatpush3.msra.mxu0 %v158_v2  ;;  %2339 = vmatprep.mubr.f32.mxu1 %v81_v9  ;;  %v149_v14 = vld [vmem:[%s3609_s2 + $0x20] sm:$0xff]  ;;  %v18_v21 = vld [vmem:[%s3610_s0 + $0x8] sm:$0xff]  ;;  %v20_v23 = vld [vmem:[%s3610_s0 + $0x18] sm:$0xff] }
   0x8   :  { %2185 = vmatprep.subr.mxu0 %v157_v3  ;;  %v2618_v16 = vld [vmem:[%s3611_s1 + $0x100] sm:$0xff]  ;;  %v22_v25 = vld [vmem:[%s3610_s0 + $0x28] sm:$0xff]  ;;  %v23_v26 = vld [vmem:[%s3610_s0 + $0x30] sm:$0xff] }
   0x9   :  { %2186 = vmatpush3.msra.mxu0 %v157_v3  ;;  %225 = vadd.xlane.f32.xlu1 %v2618_v16  ;;  %v145_v19 = vld [vmem:[%s3609_s2] sm:$0xff]  ;;  %v24_v27 = vld [vmem:[%s3610_s0 + $0x38] sm:$0xff]  ;;  %v26_v29 = vld [vmem:[%s3610_s0 + $0x48] sm:$0xff] }
   0xa   :  { %2187 = vmatprep.subr.mxu0 %v156_v5  ;;  %193 = vadd.xlane.f32.xlu0 %v2603_v12  ;;  %v2633_v20 = vld [vmem:[%s3611_s1 + $0x180] sm:$0xff]  ;;  %v27_v30 = vld [vmem:[%s3610_s0 + $0x50] sm:$0xff]  ;;  %v28_v31 = vld [vmem:[%s3610_s0 + $0x58] sm:$0xff] }
   0xb   :  { %2188 = vmatpush3.msra.mxu0 %v156_v5  ;;  %v21_v24 = vld [vmem:[%s3610_s0 + $0x20] sm:$0xff]  ;;  %v30_v33 = vld [vmem:[%s3610_s0 + $0x68] sm:$0xff]  ;;  %v31_v34 = vld [vmem:[%s3610_s0 + $0x70] sm:$0xff] }
   0xc   :  { %2189 = vmatprep.subr.mxu0 %v155_v6  ;;  %v25_v28 = vld [vmem:[%s3610_s0 + $0x40] sm:$0xff]  ;;  %v32_v35 = vld [vmem:[%s3610_s0 + $0x78] sm:$0xff]  ;;  %v34_v37 = vld [vmem:[%s3610_s0 + $0x88] sm:$0xff] }
   0xd   :  { %2190 = vmatpush3.msra.mxu0 %v155_v6  ;;  %257 = vadd.xlane.f32.xlu1 %v2633_v20  ;;  %v29_v32 = vld [vmem:[%s3610_s0 + $0x60] sm:$0xff]  ;;  %v35_v38 = vld [vmem:[%s3610_s0 + $0x90] sm:$0xff]  ;;  %v36_v39 = vld [vmem:[%s3610_s0 + $0x98] sm:$0xff] }
   0xe   :  { %2191 = vmatprep.subr.mxu0 %v154_v7  ;;  %v33_v36 = vld [vmem:[%s3610_s0 + $0x80] sm:$0xff]  ;;  %v38_v41 = vld [vmem:[%s3610_s0 + $0xa8] sm:$0xff]  ;;  %v39_v42 = vld [vmem:[%s3610_s0 + $0xb0] sm:$0xff] }
   0xf   :  { %2192 = vmatpush3.msra.mxu0 %v154_v7  ;;  %v37_v40 = vld [vmem:[%s3610_s0 + $0xa0] sm:$0xff]  ;;  %v40_v43 = vld [vmem:[%s3610_s0 + $0xb8] sm:$0xff]  ;;  %v42_v45 = vld [vmem:[%s3610_s0 + $0xc8] sm:$0xff] }
  0x10   :  { %2193 = vmatprep.subr.mxu0 %v153_v8  ;;  %v41_v44 = vld [vmem:[%s3610_s0 + $0xc0] sm:$0xff]  ;;  %v43_v46 = vld [vmem:[%s3610_s0 + $0xd0] sm:$0xff]  ;;  %v44_v47 = vld [vmem:[%s3610_s0 + $0xd8] sm:$0xff] }
  0x11   :  { %2194 = vmatpush3.msra.mxu0 %v153_v8  ;;  %v45_v48 = vld [vmem:[%s3610_s0 + $0xe0] sm:$0xff]  ;;  %v46_v49 = vld [vmem:[%s3610_s0 + $0xe8] sm:$0xff]  ;;  %v47_v50 = vld [vmem:[%s3610_s0 + $0xf0] sm:$0xff] }
  0x12   :  { %2195 = vmatprep.subr.mxu0 %v152_v10  ;;  %v48_v51 = vld [vmem:[%s3610_s0 + $0xf8] sm:$0xff]  ;;  %v49_v52 = vld [vmem:[%s3610_s0 + $0x100] sm:$0xff]  ;;  %v50_v53 = vld [vmem:[%s3610_s0 + $0x108] sm:$0xff] }
  0x13   :  { %2196 = vmatpush3.msra.mxu0 %v152_v10  ;;  %v51_v54 = vld [vmem:[%s3610_s0 + $0x110] sm:$0xff]  ;;  %v52_v55 = vld [vmem:[%s3610_s0 + $0x118] sm:$0xff]  ;;  %v53_v56 = vld [vmem:[%s3610_s0 + $0x120] sm:$0xff] }
  0x14   :  { %2197 = vmatprep.subr.mxu0 %v151_v11  ;;  %v54_v57 = vld [vmem:[%s3610_s0 + $0x128] sm:$0xff]  ;;  %v55_v58 = vld [vmem:[%s3610_s0 + $0x130] sm:$0xff]  ;;  %v56_v59 = vld [vmem:[%s3610_s0 + $0x138] sm:$0xff] }
  0x15   :  { %2198 = vmatpush3.msra.mxu0 %v151_v11  ;;  %v57_v60 = vld [vmem:[%s3610_s0 + $0x140] sm:$0xff]  ;;  %v58_v61 = vld [vmem:[%s3610_s0 + $0x148] sm:$0xff]  ;;  %v59_v62 = vld [vmem:[%s3610_s0 + $0x150] sm:$0xff] }
  0x16   :  { %2199 = vmatprep.subr.mxu0 %v150_v13  ;;  %v60_v63 = vld [vmem:[%s3610_s0 + $0x158] sm:$0xff]  ;;  %v61_v0 = vld [vmem:[%s3610_s0 + $0x160] sm:$0xff]  ;;  %v62_v1 = vld [vmem:[%s3610_s0 + $0x168] sm:$0xff] }
  0x17   :  { %2200 = vmatpush3.msra.mxu0 %v150_v13  ;;  %v63_v2 = vld [vmem:[%s3610_s0 + $0x170] sm:$0xff]  ;;  %v64_v3 = vld [vmem:[%s3610_s0 + $0x178] sm:$0xff]  ;;  %v65_v4 = vld [vmem:[%s3610_s0 + $0x180] sm:$0xff] }
  0x18   :  { %2201 = vmatprep.subr.mxu0 %v149_v14  ;;  %v66_v5 = vld [vmem:[%s3610_s0 + $0x188] sm:$0xff]  ;;  %v67_v6 = vld [vmem:[%s3610_s0 + $0x190] sm:$0xff]  ;;  %v68_v7 = vld [vmem:[%s3610_s0 + $0x198] sm:$0xff] }
  0x19   :  { %2202 = vmatpush3.msra.mxu0 %v149_v14  ;;  %v69_v8 = vld [vmem:[%s3610_s0 + $0x1a0] sm:$0xff]  ;;  %v70_v9 = vld [vmem:[%s3610_s0 + $0x1a8] sm:$0xff]  ;;  %v71_v10 = vld [vmem:[%s3610_s0 + $0x1b0] sm:$0xff] }
  0x1a   :  { %2203 = vmatprep.subr.mxu0 %v148_v15  ;;  %v72_v11 = vld [vmem:[%s3610_s0 + $0x1b8] sm:$0xff]  ;;  %v73_v13 = vld [vmem:[%s3610_s0 + $0x1c0] sm:$0xff]  ;;  %v74_v14 = vld [vmem:[%s3610_s0 + $0x1c8] sm:$0xff] }
  0x1b   :  { %2204 = vmatpush3.msra.mxu0 %v148_v15  ;;  %v75_v15 = vld [vmem:[%s3610_s0 + $0x1d0] sm:$0xff] }
  0x1c   :  { %2205 = vmatprep.subr.mxu0 %v147_v17 }
  0x1d   :  { %2206 = vmatpush3.msra.mxu0 %v147_v17  ;;  %v76_v17 = vld [vmem:[%s3610_s0 + $0x1d8] sm:$0xff] }
  0x1e   :  { %2207 = vmatprep.subr.mxu0 %v146_v18 }
  0x1f   :  { %2208 = vmatpush3.msra.mxu0 %v146_v18  ;;  %v77_v18 = vld [vmem:[%s3610_s0 + $0x1e0] sm:$0xff] }
  0x20   :  { %2209 = vmatprep.subr.mxu0 %v145_v19 }
  0x21   :  { %2210 = vmatpush3.msra.mxu0 %v145_v19  ;;  %v78_v19 = vld [vmem:[%s3610_s0 + $0x1e8] sm:$0xff] }
  0x22   :  { %2212 = vmatmul.mubr.f32.vlgmr.msra.gmra.mxu0 %v18_v21  ;;  %v79_v21 = vld [vmem:[%s3610_s0 + $0x1f0] sm:$0xff] }
  0x23   :  { %2214 = vmatprep.mubr.f32.mxu0 %v19_v22  ;;  %v80_v22 = vld [vmem:[%s3610_s0 + $0x1f8] sm:$0xff] }
  0x26   :  { %2215 = vmatmul.mubr.f32.gmra.mxu0 %v20_v23 }
  0x27   :  { %2217 = vmatprep.mubr.f32.mxu0 %v21_v24 }
  0x2a   :  { %2218 = vmatmul.mubr.f32.gmra.mxu0 %v22_v25 }
  0x2b   :  { %2220 = vmatprep.mubr.f32.mxu0 %v23_v26 }
  0x2e   :  { %2221 = vmatmul.mubr.f32.gmra.mxu0 %v24_v27 }
  0x2f   :  { %2223 = vmatprep.mubr.f32.mxu0 %v25_v28 }
  0x32   :  { %2224 = vmatmul.mubr.f32.gmra.mxu0 %v26_v29 }
  0x33   :  { %2226 = vmatprep.mubr.f32.mxu0 %v27_v30 }
  0x36   :  { %2227 = vmatmul.mubr.f32.gmra.mxu0 %v28_v31 }
  0x37   :  { %2229 = vmatprep.mubr.f32.mxu0 %v29_v32 }
  0x3a   :  { %2230 = vmatmul.mubr.f32.gmra.mxu0 %v30_v33 }
  0x3b   :  { %2232 = vmatprep.mubr.f32.mxu0 %v31_v34 }
  0x3e   :  { %2233 = vmatmul.mubr.f32.gmra.mxu0 %v32_v35 }
  0x3f   :  { %2235 = vmatprep.mubr.f32.mxu0 %v33_v36 }
  0x42   :  { %2236 = vmatmul.mubr.f32.gmra.mxu0 %v34_v37 }
  0x43   :  { %2238 = vmatprep.mubr.f32.mxu0 %v35_v38 }
  0x46   :  { %2239 = vmatmul.mubr.f32.gmra.mxu0 %v36_v39 }
  0x47   :  { %2241 = vmatprep.mubr.f32.mxu0 %v37_v40 }
  0x4a   :  { %2242 = vmatmul.mubr.f32.gmra.mxu0 %v38_v41 }
  0x4b   :  { %2244 = vmatprep.mubr.f32.mxu0 %v39_v42 }
  0x4e   :  { %2245 = vmatmul.mubr.f32.gmra.mxu0 %v40_v43 }
  0x4f   :  { %2247 = vmatprep.mubr.f32.mxu0 %v41_v44 }
  0x52   :  { %2248 = vmatmul.mubr.f32.gmra.mxu0 %v42_v45 }
  0x53   :  { %2250 = vmatprep.mubr.f32.mxu0 %v43_v46 }
  0x56   :  { %2251 = vmatmul.mubr.f32.gmra.mxu0 %v44_v47 }
  0x57   :  { %2253 = vmatprep.mubr.f32.mxu0 %v45_v48 }
  0x5a   :  { %2254 = vmatmul.mubr.f32.gmra.mxu0 %v46_v49 }
  0x5b   :  { %2256 = vmatprep.mubr.f32.mxu0 %v47_v50 }
  0x5e   :  { %2257 = vmatmul.mubr.f32.gmra.mxu0 %v48_v51 }
  0x5f   :  { %2259 = vmatprep.mubr.f32.mxu0 %v49_v52 }
  0x62   :  { %2260 = vmatmul.mubr.f32.gmra.mxu0 %v50_v53 }
  0x63   :  { %2262 = vmatprep.mubr.f32.mxu0 %v51_v54 }
  0x66   :  { %2263 = vmatmul.mubr.f32.gmra.mxu0 %v52_v55 }
  0x67   :  { %2265 = vmatprep.mubr.f32.mxu0 %v53_v56 }
  0x6a   :  { %2266 = vmatmul.mubr.f32.gmra.mxu0 %v54_v57  ;;  %v82_v57 = vld [vmem:[%s3611_s1 + $0x8] sm:$0xff] }
  0x6b   :  { %2268 = vmatprep.mubr.f32.mxu0 %v55_v58  ;;  %v83_v58 = vld [vmem:[%s3611_s1 + $0x10] sm:$0xff] }
  0x6e   :  { %2269 = vmatmul.mubr.f32.gmra.mxu0 %v56_v59 }
  0x6f   :  { %2271 = vmatprep.mubr.f32.mxu0 %v57_v60 }
  0x72   :  { %2272 = vmatmul.mubr.f32.gmra.mxu0 %v58_v61  ;;  %v84_v61 = vld [vmem:[%s3611_s1 + $0x18] sm:$0xff] }
  0x73   :  { %2274 = vmatprep.mubr.f32.mxu0 %v59_v62  ;;  %v85_v62 = vld [vmem:[%s3611_s1 + $0x20] sm:$0xff] }
  0x76   :  { %2275 = vmatmul.mubr.f32.gmra.mxu0 %v60_v63 }
  0x77   :  { %2277 = vmatprep.mubr.f32.mxu0 %v61_v0 }
  0x7a   :  { %2278 = vmatmul.mubr.f32.gmra.mxu0 %v62_v1  ;;  %v86_v1 = vld [vmem:[%s3611_s1 + $0x28] sm:$0xff] }
  0x7b   :  { %2280 = vmatprep.mubr.f32.mxu0 %v63_v2  ;;  %v87_v2 = vld [vmem:[%s3611_s1 + $0x30] sm:$0xff] }
  0x7e   :  { %2281 = vmatmul.mubr.f32.gmra.mxu0 %v64_v3 }
  0x7f   :  { %2283 = vmatprep.mubr.f32.mxu0 %v65_v4 }
  0x82   :  { %2284 = vmatmul.mubr.f32.gmra.mxu0 %v66_v5 }
  0x83   :  { %2286 = vmatprep.mubr.f32.mxu0 %v67_v6  ;;  %v88_v6 = vld [vmem:[%s3611_s1 + $0x38] sm:$0xff] }
  0x86   :  { %2287 = vmatmul.mubr.f32.gmra.mxu0 %v68_v7 }
  0x87   :  { %2289 = vmatprep.mubr.f32.mxu0 %v69_v8  ;;  %v89_v8 = vld [vmem:[%s3611_s1 + $0x40] sm:$0xff] }
  0x8a   :  { %2290 = vmatmul.mubr.f32.gmra.mxu0 %v70_v9 }
  0x8b   :  { %2292 = vmatprep.mubr.f32.mxu0 %v71_v10 }
  0x8e   :  { %2293 = vmatmul.mubr.f32.gmra.mxu0 %v72_v11  ;;  %v90_v11 = vld [vmem:[%s3611_s1 + $0x48] sm:$0xff] }
  0x8f   :  { %2295 = vmatprep.mubr.f32.mxu0 %v73_v13  ;;  %v162_v41 = vpop.xlane.xlu0 %161  ;;  %v91_v13 = vld [vmem:[%s3611_s1 + $0x50] sm:$0xff] }
  0x90   :  { %v289_v44 = vadd.f32 1.0, %v162_v41  ;;  %v95_v41 = vld [vmem:[%s3611_s1 + $0x70] sm:$0xff] }
  0x92   :  { %2296 = vmatmul.mubr.f32.gmra.mxu0 %v74_v14  ;;  %2531 = vrsqrt.f32 %v289_v44 }
  0x93   :  { %2298 = vmatprep.mubr.f32.mxu0 %v75_v15  ;;  %v194_v3 = vpop.xlane.xlu0 %193 }
  0x94   :  { %v305_v7 = vadd.f32 1.0, %v194_v3  ;;  %v99_v3 = vld [vmem:[%s3611_s1 + $0x90] sm:$0xff] }
  0x96   :  { %2299 = vmatmul.mubr.f32.gmra.mxu0 %v76_v17  ;;  %2533 = vrsqrt.f32 %v305_v7  ;;  %v92_v17 = vld [vmem:[%s3611_s1 + $0x58] sm:$0xff] }
  0x97   :  { %2301 = vmatprep.mubr.f32.mxu0 %v77_v18  ;;  %v93_v18 = vld [vmem:[%s3611_s1 + $0x60] sm:$0xff] }
  0x9a   :  { %2302 = vmatmul.mubr.f32.gmra.mxu0 %v78_v19 }
  0x9b   :  { %2304 = vmatprep.mubr.f32.mxu0 %v79_v21 }
  0x9e   :  { %2305 = vmatmul.mubr.f32.gmra.mxu0 %v80_v22  ;;  %v94_v22 = vld [vmem:[%s3611_s1 + $0x68] sm:$0xff] }
  0x9f   :  { %v2908_v53 = vpop.eup %2531 }
  0xe2   :  { %v2825_v23 = vpop.f32.mrf.mxu0 }
  0xe4   :  { %v2827_v24 = vpop.f32.mrf.mxu0 }
  0xe5   :  { %v995_v55 = vmul.f32 %v2908_v53, %v2827_v24 }
  0xe6   :  { %v2829_v25 = vpop.f32.mrf.mxu0 }
  0xe8   :  { %v2831_v26 = vpop.f32.mrf.mxu0 }
  0xea   :  { %v2833_v27 = vpop.f32.mrf.mxu0 }
  0xec   :  { %v2835_v28 = vpop.f32.mrf.mxu0 }
  0xee   :  { %v2837_v29 = vpop.f32.mrf.mxu0 }
  0xf0   :  { %v2839_v30 = vpop.f32.mrf.mxu0 }
  0xf2   :  { %v2841_v31 = vpop.f32.mrf.mxu0 }
  0xf4   :  { %v2843_v32 = vpop.f32.mrf.mxu0 }
  0xf6   :  { %v2845_v33 = vpop.f32.mrf.mxu0 }
  0xf8   :  { %v2847_v34 = vpop.f32.mrf.mxu0 }
  0xfa   :  { %v2849_v35 = vpop.f32.mrf.mxu0 }
  0xfc   :  { %v2851_v36 = vpop.f32.mrf.mxu0 }
  0xfe   :  { %v2853_v37 = vpop.f32.mrf.mxu0 }
  0xff   :  { %2307 = vmatprep.subr.mxu1 %v2853_v37 }
 0x100   :  { %v2856_v38 = vpop.f32.mrf.mxu0  ;;  %2308 = vmatpush3.msra.mxu1 %v2853_v37 }
 0x101   :  { %2309 = vmatprep.subr.mxu1 %v2856_v38 }
 0x102   :  { %v2860_v39 = vpop.f32.mrf.mxu0  ;;  %2310 = vmatpush3.msra.mxu1 %v2856_v38 }
 0x103   :  { %2311 = vmatprep.subr.mxu1 %v2849_v35 }
 0x104   :  { %v2864_v40 = vpop.f32.mrf.mxu0  ;;  %2312 = vmatpush3.msra.mxu1 %v2849_v35 }
 0x105   :  { %2313 = vmatprep.subr.mxu1 %v2851_v36 }
 0x106   :  { %v2868_v42 = vpop.f32.mrf.mxu0  ;;  %2314 = vmatpush3.msra.mxu1 %v2851_v36 }
 0x107   :  { %2315 = vmatprep.subr.mxu1 %v2845_v33 }
 0x108   :  { %v2872_v43 = vpop.f32.mrf.mxu0  ;;  %2316 = vmatpush3.msra.mxu1 %v2845_v33 }
 0x109   :  { %2317 = vmatprep.subr.mxu1 %v2847_v34 }
 0x10a   :  { %v2876_v45 = vpop.f32.mrf.mxu0  ;;  %2318 = vmatpush3.msra.mxu1 %v2847_v34 }
 0x10b   :  { %2319 = vmatprep.subr.mxu1 %v2841_v31 }
 0x10c   :  { %v2880_v46 = vpop.f32.mrf.mxu0  ;;  %2320 = vmatpush3.msra.mxu1 %v2841_v31 }
 0x10d   :  { %2321 = vmatprep.subr.mxu1 %v2843_v32 }
 0x10e   :  { %v2884_v47 = vpop.f32.mrf.mxu0  ;;  %2322 = vmatpush3.msra.mxu1 %v2843_v32 }
 0x10f   :  { %2323 = vmatprep.subr.mxu1 %v2837_v29 }
 0x110   :  { %v2888_v48 = vpop.f32.mrf.mxu0  ;;  %2324 = vmatpush3.msra.mxu1 %v2837_v29 }
 0x111   :  { %2325 = vmatprep.subr.mxu1 %v2839_v30 }
 0x112   :  { %v2892_v49 = vpop.f32.mrf.mxu0  ;;  %2326 = vmatpush3.msra.mxu1 %v2839_v30 }
 0x113   :  { %2327 = vmatprep.subr.mxu1 %v2833_v27 }
 0x114   :  { %v2896_v50 = vpop.f32.mrf.mxu0  ;;  %2328 = vmatpush3.msra.mxu1 %v2833_v27 }
 0x115   :  { %2329 = vmatprep.subr.mxu1 %v2835_v28 }
 0x116   :  { %v2900_v51 = vpop.f32.mrf.mxu0  ;;  %2330 = vmatpush3.msra.mxu1 %v2835_v28 }
 0x117   :  { %2331 = vmatprep.subr.mxu1 %v2829_v25 }
 0x118   :  { %v2904_v52 = vpop.f32.mrf.mxu0  ;;  %2332 = vmatpush3.msra.mxu1 %v2829_v25 }
 0x119   :  { %2333 = vmatprep.subr.mxu1 %v2831_v26 }
 0x11a   :  { %v2910_v54 = vpop.f32.mrf.mxu0  ;;  %2334 = vmatpush3.msra.mxu1 %v2831_v26 }
 0x11b   :  { %2335 = vmatprep.subr.mxu1 %v2825_v23 }
 0x11c   :  { %v2916_v56 = vpop.f32.mrf.mxu0  ;;  %2336 = vmatpush3.msra.mxu1 %v2825_v23 }
 0x11d   :  { %2337 = vmatprep.subr.mxu1 %v995_v55 }
 0x11e   :  { %v2925_v59 = vpop.f32.mrf.mxu0  ;;  %2338 = vmatpush3.msra.mxu1 %v995_v55 }
 0x11f   :  { %2340 = vmatmul.mubr.f32.vlgmr.msra.gmra.mxu1 %v82_v57  ;;  %2363 = vmatprep.subr.mxu1 %v2925_v59  ;;  %v96_v57 = vld [vmem:[%s3611_s1 + $0x78] sm:$0xff] }
 0x120   :  { %v2928_v60 = vpop.f32.mrf.mxu0  ;;  %2364 = vmatpush3.msra.mxu1 %v2925_v59  ;;  %2342 = vmatprep.mubr.f32.mxu1 %v83_v58  ;;  %v3019_v58 = vpop.eup %2533 }
 0x121   :  { %2365 = vmatprep.subr.mxu1 %v2928_v60 }
 0x122   :  { %v2938_v63 = vpop.f32.mrf.mxu0  ;;  %2366 = vmatpush3.msra.mxu1 %v2928_v60 }
 0x123   :  { %2343 = vmatmul.mubr.f32.gmra.mxu1 %v84_v61  ;;  %2367 = vmatprep.subr.mxu1 %v2910_v54 }
 0x124   :  { %v2942_v0 = vpop.f32.mrf.mxu0  ;;  %2368 = vmatpush3.msra.mxu1 %v2910_v54  ;;  %2345 = vmatprep.mubr.f32.mxu1 %v85_v62  ;;  %v1011_v62 = vmul.f32 %v3019_v58, %v2864_v40 }
 0x125   :  { %2369 = vmatprep.subr.mxu1 %v2916_v56 }
 0x126   :  { %v2952_v4 = vpop.f32.mrf.mxu0  ;;  %2370 = vmatpush3.msra.mxu1 %v2916_v56 }
 0x127   :  { %2346 = vmatmul.mubr.f32.gmra.mxu1 %v86_v1  ;;  %2371 = vmatprep.subr.mxu1 %v2900_v51 }
 0x128   :  { %v2956_v5 = vpop.f32.mrf.mxu0  ;;  %2372 = vmatpush3.msra.mxu1 %v2900_v51  ;;  %2348 = vmatprep.mubr.f32.mxu1 %v87_v2  ;;  %v98_v2 = vld [vmem:[%s3611_s1 + $0x88] sm:$0xff] }
 0x129   :  { %2373 = vmatprep.subr.mxu1 %v2904_v52 }
 0x12a   :  { %v2966_v9 = vpop.f32.mrf.mxu0  ;;  %2374 = vmatpush3.msra.mxu1 %v2904_v52 }
 0x12b   :  { %2349 = vmatmul.mubr.f32.gmra.mxu1 %v88_v6  ;;  %2375 = vmatprep.subr.mxu1 %v2892_v49 }
 0x12c   :  { %v2970_v10 = vpop.f32.mrf.mxu0  ;;  %2376 = vmatpush3.msra.mxu1 %v2892_v49  ;;  %2351 = vmatprep.mubr.f32.mxu1 %v89_v8  ;;  %v101_v8 = vld [vmem:[%s3611_s1 + $0xa0] sm:$0xff] }
 0x12d   :  { %2377 = vmatprep.subr.mxu1 %v2896_v50 }
 0x12e   :  { %v2980_v14 = vpop.f32.mrf.mxu0  ;;  %2378 = vmatpush3.msra.mxu1 %v2896_v50 }
 0x12f   :  { %2352 = vmatmul.mubr.f32.gmra.mxu1 %v90_v11  ;;  %2379 = vmatprep.subr.mxu1 %v2884_v47 }
 0x130   :  { %v2984_v15 = vpop.f32.mrf.mxu0  ;;  %2380 = vmatpush3.msra.mxu1 %v2884_v47  ;;  %2354 = vmatprep.mubr.f32.mxu1 %v91_v13 }
 0x131   :  { %3631 = vst [vmem:[#allocation2_spill] sm:$0xff] %v2984_v15  ;;  %2381 = vmatprep.subr.mxu1 %v2888_v48 }
 0x132   :  { %v2994_v19 = vpop.f32.mrf.mxu0  ;;  %2382 = vmatpush3.msra.mxu1 %v2888_v48 }
 0x133   :  { %3632 = vst [vmem:[#allocation3_spill] sm:$0xff] %v2994_v19  ;;  %2355 = vmatmul.mubr.f32.gmra.mxu1 %v92_v17  ;;  %2383 = vmatprep.subr.mxu1 %v2876_v45  ;;  %v102_v17 = vld [vmem:[%s3611_s1 + $0xa8] sm:$0xff] }
 0x134   :  { %v2998_v21 = vpop.f32.mrf.mxu0  ;;  %2384 = vmatpush3.msra.mxu1 %v2876_v45  ;;  %2357 = vmatprep.mubr.f32.mxu1 %v93_v18  ;;  %v103_v18 = vld [vmem:[%s3611_s1 + $0xb0] sm:$0xff] }
 0x135   :  { %3633 = vst [vmem:[#allocation4_spill] sm:$0xff] %v2998_v21  ;;  %2385 = vmatprep.subr.mxu1 %v2880_v46 }
 0x136   :  { %v3008_v44 = vpop.f32.mrf.mxu0  ;;  %2386 = vmatpush3.msra.mxu1 %v2880_v46 }
 0x137   :  { %3634 = vst [vmem:[#allocation5_spill] sm:$0xff] %v3008_v44  ;;  %2358 = vmatmul.mubr.f32.gmra.mxu1 %v94_v22  ;;  %2387 = vmatprep.subr.mxu1 %v2868_v42  ;;  %v226_v22 = vpop.xlane.xlu1 %225 }
 0x138   :  { %v3012_v55 = vpop.f32.mrf.mxu0  ;;  %2388 = vmatpush3.msra.mxu1 %v2868_v42  ;;  %2360 = vmatprep.mubr.f32.mxu1 %v95_v41 }
 0x139   :  { %3635 = vst [vmem:[#allocation6_spill] sm:$0xff] %v3012_v55  ;;  %2389 = vmatprep.subr.mxu1 %v2872_v43 }
 0x13a   :  { %v3021_v61 = vpop.f32.mrf.mxu0  ;;  %2390 = vmatpush3.msra.mxu1 %v2872_v43 }
 0x13b   :  { %3636 = vst [vmem:[#allocation7_spill] sm:$0xff] %v3021_v61  ;;  %2361 = vmatmul.mubr.f32.gmra.mxu1 %v96_v57  ;;  %2391 = vmatprep.subr.mxu1 %v2860_v39 }
 0x13c   :  { %v3027_v1 = vpop.f32.mrf.mxu0  ;;  %2392 = vmatpush3.msra.mxu1 %v2860_v39  ;;  %2395 = vmatprep.mubr.f32.mxu1 %v2603_v12  ;;  %v100_v12 = vld [vmem:[%s3611_s1 + $0x98] sm:$0xff] }
 0x13d   :  { %3637 = vst [vmem:[#allocation8_spill] sm:$0xff] %v3027_v1  ;;  %2393 = vmatprep.subr.mxu1 %v1011_v62 }
 0x13e   :  { %v3037_v6 = vpop.f32.mrf.mxu0  ;;  %2394 = vmatpush3.msra.mxu1 %v1011_v62  ;;  %v104_v62 = vld [vmem:[%s3611_s1 + $0xb8] sm:$0xff] }
 0x13f   :  { %3638 = vst [vmem:[#allocation9_spill] sm:$0xff] %v3037_v6  ;;  %2396 = vmatmul.mubr.f32.vlgmr.msra.gmra.mxu1 %v98_v2  ;;  %2419 = vmatprep.subr.mxu1 %v3037_v6  ;;  %v321_v2 = vadd.f32 1.0, %v226_v22 }
 0x140   :  { %v3040_v7 = vpop.f32.mrf.mxu0  ;;  %2420 = vmatpush3.msra.mxu1 %v3037_v6  ;;  %2398 = vmatprep.mubr.f32.mxu1 %v99_v3  ;;  %v105_v3 = vld [vmem:[%s3611_s1 + $0xc0] sm:$0xff]  ;;  %v111_v6 = vld [vmem:[%s3611_s1 + $0xf0] sm:$0xff] }
 0x141   :  { %3639 = vst [vmem:[#allocation10_spill] sm:$0xff] %v3040_v7  ;;  %2421 = vmatprep.subr.mxu1 %v3040_v7  ;;  %2535 = vrsqrt.f32 %v321_v2  ;;  %v108_v2 = vld [vmem:[%s3611_s1 + $0xd8] sm:$0xff] }
 0x142   :  { %v3050_v11 = vpop.f32.mrf.mxu0  ;;  %2422 = vmatpush3.msra.mxu1 %v3040_v7 }
 0x143   :  { %2399 = vmatmul.mubr.f32.gmra.mxu1 %v100_v12  ;;  %2423 = vmatprep.subr.mxu1 %v3021_v61 }
 0x144   :  { %v3054_v13 = vpop.f32.mrf.mxu0  ;;  %2424 = vmatpush3.msra.mxu1 %v3021_v61  ;;  %2401 = vmatprep.mubr.f32.mxu1 %v101_v8 }
 0x145   :  { %2425 = vmatprep.subr.mxu1 %v3027_v1 }
 0x146   :  { %v3064_v41 = vpop.f32.mrf.mxu0  ;;  %2426 = vmatpush3.msra.mxu1 %v3027_v1 }
 0x147   :  { %2402 = vmatmul.mubr.f32.gmra.mxu1 %v102_v17  ;;  %2427 = vmatprep.subr.mxu1 %v3008_v44  ;;  %v106_v17 = vld [vmem:[%s3611_s1 + $0xc8] sm:$0xff] }
 0x148   :  { %v3068_v57 = vpop.f32.mrf.mxu0  ;;  %2428 = vmatpush3.msra.mxu1 %v3008_v44  ;;  %2404 = vmatprep.mubr.f32.mxu1 %v103_v18  ;;  %v107_v18 = vld [vmem:[%s3611_s1 + $0xd0] sm:$0xff] }
 0x149   :  { %2429 = vmatprep.subr.mxu1 %v3012_v55 }
 0x14a   :  { %v3078_v12 = vpop.f32.mrf.mxu0  ;;  %2430 = vmatpush3.msra.mxu1 %v3012_v55 }
 0x14b   :  { %2405 = vmatmul.mubr.f32.gmra.mxu1 %v104_v62  ;;  %2431 = vmatprep.subr.mxu1 %v2994_v19 }
 0x14c   :  { %v3082_v8 = vpop.f32.mrf.mxu0  ;;  %2432 = vmatpush3.msra.mxu1 %v2994_v19  ;;  %2407 = vmatprep.mubr.f32.mxu1 %v105_v3  ;;  %v109_v3 = vld [vmem:[%s3611_s1 + $0xe0] sm:$0xff] }
 0x14d   :  { %2433 = vmatprep.subr.mxu1 %v2998_v21 }
 0x14e   :  { %v3092_v22 = vpop.f32.mrf.mxu0  ;;  %2434 = vmatpush3.msra.mxu1 %v2998_v21  ;;  %v3131_v61 = vpop.eup %2535  ;;  %v115_v21 = vld [vmem:[%s3611_s1 + $0x110] sm:$0xff] }
 0x14f   :  { %2408 = vmatmul.mubr.f32.gmra.mxu1 %v106_v17  ;;  %2435 = vmatprep.subr.mxu1 %v2980_v14 }
 0x150   :  { %v3096_v62 = vpop.f32.mrf.mxu0  ;;  %2436 = vmatpush3.msra.mxu1 %v2980_v14  ;;  %2410 = vmatprep.mubr.f32.mxu1 %v107_v18  ;;  %v110_v18 = vld [vmem:[%s3611_s1 + $0xe8] sm:$0xff] }
 0x151   :  { %2437 = vmatprep.subr.mxu1 %v2984_v15 }
 0x152   :  { %v3106_v7 = vpop.f32.mrf.mxu0  ;;  %2438 = vmatpush3.msra.mxu1 %v2984_v15  ;;  %v117_v15 = vld [vmem:[%s3611_s1 + $0x120] sm:$0xff] }
 0x153   :  { %3640 = vst [vmem:[#allocation11_spill] sm:$0xff] %v3106_v7  ;;  %2411 = vmatmul.mubr.f32.gmra.mxu1 %v108_v2  ;;  %2439 = vmatprep.subr.mxu1 %v2966_v9 }
 0x154   :  { %v3110_v17 = vpop.f32.mrf.mxu0  ;;  %2440 = vmatpush3.msra.mxu1 %v2966_v9  ;;  %2413 = vmatprep.mubr.f32.mxu1 %v109_v3  ;;  %v112_v3 = vld [vmem:[%s3611_s1 + $0xf8] sm:$0xff] }
 0x155   :  { %3641 = vst [vmem:[#allocation12_spill] sm:$0xff] %v3110_v17  ;;  %2441 = vmatprep.subr.mxu1 %v2970_v10 }
 0x156   :  { %v3120_v1 = vpop.f32.mrf.mxu0  ;;  %2442 = vmatpush3.msra.mxu1 %v2970_v10 }
 0x157   :  { %3642 = vst [vmem:[#allocation13_spill] sm:$0xff] %v3120_v1  ;;  %2414 = vmatmul.mubr.f32.gmra.mxu1 %v110_v18  ;;  %2443 = vmatprep.subr.mxu1 %v2952_v4  ;;  %v1027_v18 = vmul.f32 %v3131_v61, %v2942_v0 }
 0x158   :  { %v3124_v2 = vpop.f32.mrf.mxu0  ;;  %2444 = vmatpush3.msra.mxu1 %v2952_v4  ;;  %2416 = vmatprep.mubr.f32.mxu1 %v111_v6  ;;  %v114_v6 = vld [vmem:[%s3611_s1 + $0x108] sm:$0xff] }
 0x159   :  { %3643 = vst [vmem:[#allocation14_spill] sm:$0xff] %v3124_v2  ;;  %2445 = vmatprep.subr.mxu1 %v2956_v5 }
 0x15a   :  { %v3133_v55 = vpop.f32.mrf.mxu0  ;;  %2446 = vmatpush3.msra.mxu1 %v2956_v5 }
 0x15b   :  { %3644 = vst [vmem:[#allocation15_spill] sm:$0xff] %v3133_v55  ;;  %2417 = vmatmul.mubr.f32.gmra.mxu1 %v112_v3  ;;  %2447 = vmatprep.subr.mxu1 %v2938_v63 }
 0x15c   :  { %v3139_v44 = vpop.f32.mrf.mxu0  ;;  %2448 = vmatpush3.msra.mxu1 %v2938_v63  ;;  %2451 = vmatprep.mubr.f32.mxu1 %v2618_v16  ;;  %v116_v16 = vld [vmem:[%s3611_s1 + $0x118] sm:$0xff] }
 0x15d   :  { %3645 = vst [vmem:[#allocation16_spill] sm:$0xff] %v3139_v44  ;;  %2449 = vmatprep.subr.mxu1 %v1027_v18 }
 0x15e   :  { %v3149_v19 = vpop.f32.mrf.mxu0  ;;  %2450 = vmatpush3.msra.mxu1 %v1027_v18  ;;  %v119_v18 = vld [vmem:[%s3611_s1 + $0x130] sm:$0xff] }
 0x15f   :  { %3646 = vst [vmem:[#allocation17_spill] sm:$0xff] %v3149_v19  ;;  %2452 = vmatmul.mubr.f32.vlgmr.msra.gmra.mxu1 %v114_v6  ;;  %2475 = vmatprep.subr.mxu1 %v3149_v19  ;;  %v258_v6 = vpop.xlane.xlu1 %257 }
 0x160   :  { %v3152_v3 = vpop.f32.mrf.mxu0  ;;  %2476 = vmatpush3.msra.mxu1 %v3149_v19  ;;  %2454 = vmatprep.mubr.f32.mxu1 %v115_v21  ;;  %v118_v21 = vld [vmem:[%s3611_s1 + $0x128] sm:$0xff] }
 0x161   :  { %3647 = vst [vmem:[#allocation18_spill] sm:$0xff] %v3152_v3  ;;  %2477 = vmatprep.subr.mxu1 %v3152_v3 }
 0x162   :  { %2478 = vmatpush3.msra.mxu1 %v3152_v3  ;;  %v121_v3 = vld [vmem:[%s3611_s1 + $0x140] sm:$0xff] }
 0x163   :  { %2455 = vmatmul.mubr.f32.gmra.mxu1 %v116_v16  ;;  %2479 = vmatprep.subr.mxu1 %v3133_v55  ;;  %v337_v16 = vadd.f32 1.0, %v258_v6  ;;  %v125_v6 = vld [vmem:[%s3611_s1 + $0x160] sm:$0xff] }
 0x164   :  { %2480 = vmatpush3.msra.mxu1 %v3133_v55  ;;  %2457 = vmatprep.mubr.f32.mxu1 %v117_v15  ;;  %v120_v15 = vld [vmem:[%s3611_s1 + $0x138] sm:$0xff] }
 0x165   :  { %2481 = vmatprep.subr.mxu1 %v3139_v44  ;;  %2537 = vrsqrt.f32 %v337_v16  ;;  %v127_v16 = vld [vmem:[%s3611_s1 + $0x170] sm:$0xff] }
 0x166   :  { %2482 = vmatpush3.msra.mxu1 %v3139_v44 }
 0x167   :  { %2458 = vmatmul.mubr.f32.gmra.mxu1 %v118_v21  ;;  %2483 = vmatprep.subr.mxu1 %v3120_v1  ;;  %v122_v21 = vld [vmem:[%s3611_s1 + $0x148] sm:$0xff] }
 0x168   :  { %2484 = vmatpush3.msra.mxu1 %v3120_v1  ;;  %2460 = vmatprep.mubr.f32.mxu1 %v119_v18  ;;  %v123_v18 = vld [vmem:[%s3611_s1 + $0x150] sm:$0xff] }
 0x169   :  { %2485 = vmatprep.subr.mxu1 %v3124_v2 }
 0x16a   :  { %2486 = vmatpush3.msra.mxu1 %v3124_v2 }
 0x16b   :  { %2461 = vmatmul.mubr.f32.gmra.mxu1 %v120_v15  ;;  %2487 = vmatprep.subr.mxu1 %v3106_v7  ;;  %v126_v15 = vld [vmem:[%s3611_s1 + $0x168] sm:$0xff] }
 0x16c   :  { %2488 = vmatpush3.msra.mxu1 %v3106_v7  ;;  %2463 = vmatprep.mubr.f32.mxu1 %v121_v3  ;;  %v124_v3 = vld [vmem:[%s3611_s1 + $0x158] sm:$0xff] }
 0x16d   :  { %2489 = vmatprep.subr.mxu1 %v3110_v17 }
 0x16e   :  { %2490 = vmatpush3.msra.mxu1 %v3110_v17 }
 0x16f   :  { %2464 = vmatmul.mubr.f32.gmra.mxu1 %v122_v21  ;;  %2491 = vmatprep.subr.mxu1 %v3092_v22  ;;  %v128_v21 = vld [vmem:[%s3611_s1 + $0x178] sm:$0xff] }
 0x170   :  { %2492 = vmatpush3.msra.mxu1 %v3092_v22  ;;  %2466 = vmatprep.mubr.f32.mxu1 %v123_v18 }
 0x171   :  { %2493 = vmatprep.subr.mxu1 %v3096_v62 }
 0x172   :  { %2494 = vmatpush3.msra.mxu1 %v3096_v62  ;;  %v3219_v18 = vpop.eup %2537 }
 0x173   :  { %2467 = vmatmul.mubr.f32.gmra.mxu1 %v124_v3  ;;  %2495 = vmatprep.subr.mxu1 %v3078_v12  ;;  %v1043_v3 = vmul.f32 %v3219_v18, %v3054_v13 }
 0x174   :  { %2496 = vmatpush3.msra.mxu1 %v3078_v12  ;;  %2469 = vmatprep.mubr.f32.mxu1 %v125_v6  ;;  %v130_v6 = vld [vmem:[%s3611_s1 + $0x188] sm:$0xff] }
 0x175   :  { %2497 = vmatprep.subr.mxu1 %v3082_v8 }
 0x176   :  { %2498 = vmatpush3.msra.mxu1 %v3082_v8 }
 0x177   :  { %2470 = vmatmul.mubr.f32.gmra.mxu1 %v126_v15  ;;  %2499 = vmatprep.subr.mxu1 %v3064_v41  ;;  %v131_v15 = vld [vmem:[%s3611_s1 + $0x190] sm:$0xff] }
 0x178   :  { %2500 = vmatpush3.msra.mxu1 %v3064_v41  ;;  %2472 = vmatprep.mubr.f32.mxu1 %v127_v16  ;;  %v132_v16 = vld [vmem:[%s3611_s1 + $0x198] sm:$0xff] }
 0x179   :  { %2501 = vmatprep.subr.mxu1 %v3068_v57 }
 0x17a   :  { %2502 = vmatpush3.msra.mxu1 %v3068_v57 }
 0x17b   :  { %2473 = vmatmul.mubr.f32.gmra.mxu1 %v128_v21  ;;  %2503 = vmatprep.subr.mxu1 %v3050_v11  ;;  %v134_v21 = vld [vmem:[%s3611_s1 + $0x1a8] sm:$0xff] }
 0x17c   :  { %2504 = vmatpush3.msra.mxu1 %v3050_v11  ;;  %2507 = vmatprep.mubr.f32.mxu1 %v2633_v20  ;;  %v133_v20 = vld [vmem:[%s3611_s1 + $0x1a0] sm:$0xff] }
 0x17d   :  { %2505 = vmatprep.subr.mxu1 %v1043_v3 }
 0x17e   :  { %2506 = vmatpush3.msra.mxu1 %v1043_v3  ;;  %v135_v3 = vld [vmem:[%s3611_s1 + $0x1b0] sm:$0xff] }
 0x17f   :  { %2508 = vmatmul.mubr.f32.vlgmr.msra.gmra.mxu1 %v130_v6  ;;  %v136_v6 = vld [vmem:[%s3611_s1 + $0x1b8] sm:$0xff] }
 0x180   :  { %2510 = vmatprep.mubr.f32.mxu1 %v131_v15  ;;  %v137_v15 = vld [vmem:[%s3611_s1 + $0x1c0] sm:$0xff] }
 0x183   :  { %2511 = vmatmul.mubr.f32.gmra.mxu1 %v132_v16  ;;  %v138_v16 = vld [vmem:[%s3611_s1 + $0x1c8] sm:$0xff] }
 0x184   :  { %2513 = vmatprep.mubr.f32.mxu1 %v133_v20  ;;  %v139_v20 = vld [vmem:[%s3611_s1 + $0x1d0] sm:$0xff] }
 0x187   :  { %2514 = vmatmul.mubr.f32.gmra.mxu1 %v134_v21  ;;  %v140_v21 = vld [vmem:[%s3611_s1 + $0x1d8] sm:$0xff] }
 0x188   :  { %2516 = vmatprep.mubr.f32.mxu1 %v135_v3  ;;  %v141_v3 = vld [vmem:[%s3611_s1 + $0x1e0] sm:$0xff] }
 0x18b   :  { %2517 = vmatmul.mubr.f32.gmra.mxu1 %v136_v6  ;;  %v142_v6 = vld [vmem:[%s3611_s1 + $0x1e8] sm:$0xff] }
 0x18c   :  { %2519 = vmatprep.mubr.f32.mxu1 %v137_v15  ;;  %v143_v15 = vld [vmem:[%s3611_s1 + $0x1f0] sm:$0xff] }
 0x18f   :  { %2520 = vmatmul.mubr.f32.gmra.mxu1 %v138_v16  ;;  %v144_v16 = vld [vmem:[%s3611_s1 + $0x1f8] sm:$0xff] }
 0x190   :  { %2522 = vmatprep.mubr.f32.mxu1 %v139_v20  ;;  %v546_v20 = vmul.f32 %v2908_v53, %v2908_v53 }
 0x193   :  { %2523 = vmatmul.mubr.f32.gmra.mxu1 %v140_v21 }
 0x194   :  { %2525 = vmatprep.mubr.f32.mxu1 %v141_v3  ;;  %v3277_v3 = vld [vmem:[%s3612_s3] ss:$0 sm:$0xff] }
 0x197   :  { %2526 = vmatmul.mubr.f32.gmra.mxu1 %v142_v6  ;;  %v1703_v6 = vmul.f32 %v2827_v24, %v546_v20 }
 0x198   :  { %2528 = vmatprep.mubr.f32.mxu1 %v143_v15 }
 0x19b   :  { %2529 = vmatmul.mubr.f32.gmra.mxu1 %v144_v16 }
 0x1df   :  { %v2341_v21 = vpop.f32.mrf.mxu1 }
 0x1e0   :  { %v1768_v19 = vadd.f32 %v2341_v21, %v2825_v23 }
 0x1e1   :  { %v1125_v44 = vpop.f32.mrf.mxu1 }
 0x1e2   :  { %v1839_v15 = vadd.f32 %v3277_v3, %v1768_v19  ;;  %v1639_v55 = vmul.f32 %v2908_v53, %v1125_v44 }
 0x1e3   :  { %v2344_v2 = vpop.f32.mrf.mxu1 }
 0x1e4   :  { %1903 = vst [vmem:[%s3613_s4 + $0x8] sm:$0xff] %v1839_v15  ;;  %v1767_v16 = vadd.f32 %v1703_v6, %v1639_v55  ;;  %v1770_v1 = vadd.f32 %v2344_v2, %v2829_v25 }
 0x1e5   :  { %v1135_v17 = vpop.f32.mrf.mxu1 }
 0x1e6   :  { %v1838_v7 = vadd.f32 %v3277_v3, %v1767_v16  ;;  %v1841_v23 = vadd.f32 %v3277_v3, %v1770_v1  ;;  %v1769_v21 = vadd.f32 %v1135_v17, %v2831_v26 }
 0x1e7   :  { %v2347_v24 = vpop.f32.mrf.mxu1 }
 0x1e8   :  { %1902 = vst [vmem:[%s3613_s4] sm:$0xff] %v1838_v7  ;;  %1905 = vst [vmem:[%s3613_s4 + $0x18] sm:$0xff] %v1841_v23  ;;  %v1840_v53 = vadd.f32 %v3277_v3, %v1769_v21  ;;  %v1772_v25 = vadd.f32 %v2347_v24, %v2833_v27 }
 0x1e9   :  { %v1145_v19 = vpop.f32.mrf.mxu1 }
 0x1ea   :  { %1904 = vst [vmem:[%s3613_s4 + $0x10] sm:$0xff] %v1840_v53  ;;  %v1843_v26 = vadd.f32 %v3277_v3, %v1772_v25  ;;  %v1771_v44 = vadd.f32 %v1145_v19, %v2835_v28 }
 0x1eb   :  { %v2350_v55 = vpop.f32.mrf.mxu1 }
 0x1ec   :  { %1907 = vst [vmem:[%s3613_s4 + $0x28] sm:$0xff] %v1843_v26  ;;  %v1842_v1 = vadd.f32 %v3277_v3, %v1771_v44  ;;  %v1774_v7 = vadd.f32 %v2350_v55, %v2837_v29 }
 0x1ed   :  { %v1155_v17 = vpop.f32.mrf.mxu1 }
 0x1ee   :  { %1906 = vst [vmem:[%s3613_s4 + $0x20] sm:$0xff] %v1842_v1  ;;  %v1845_v27 = vadd.f32 %v3277_v3, %v1774_v7  ;;  %v1773_v2 = vadd.f32 %v1155_v17, %v2839_v30 }
 0x1ef   :  { %v2353_v20 = vpop.f32.mrf.mxu1 }
 0x1f0   :  { %1909 = vst [vmem:[%s3613_s4 + $0x38] sm:$0xff] %v1845_v27  ;;  %v1844_v28 = vadd.f32 %v3277_v3, %v1773_v2  ;;  %v1776_v6 = vadd.f32 %v2353_v20, %v2841_v31 }
 0x1f1   :  { %v1165_v15 = vpop.f32.mrf.mxu1 }
 0x1f2   :  { %1908 = vst [vmem:[%s3613_s4 + $0x30] sm:$0xff] %v1844_v28  ;;  %v1847_v29 = vadd.f32 %v3277_v3, %v1776_v6  ;;  %v1775_v16 = vadd.f32 %v1165_v15, %v2843_v32 }
 0x1f3   :  { %v2356_v23 = vpop.f32.mrf.mxu1 }
 0x1f4   :  { %1911 = vst [vmem:[%s3613_s4 + $0x48] sm:$0xff] %v1847_v29  ;;  %v1846_v30 = vadd.f32 %v3277_v3, %v1775_v16  ;;  %v1778_v21 = vadd.f32 %v2356_v23, %v2845_v33 }
 0x1f5   :  { %v1175_v24 = vpop.f32.mrf.mxu1 }
 0x1f6   :  { %1910 = vst [vmem:[%s3613_s4 + $0x40] sm:$0xff] %v1846_v30  ;;  %v1849_v31 = vadd.f32 %v3277_v3, %v1778_v21  ;;  %v1777_v53 = vadd.f32 %v1175_v24, %v2847_v34 }
 0x1f7   :  { %v2359_v25 = vpop.f32.mrf.mxu1 }
 0x1f8   :  { %1913 = vst [vmem:[%s3613_s4 + $0x58] sm:$0xff] %v1849_v31  ;;  %v1848_v32 = vadd.f32 %v3277_v3, %v1777_v53  ;;  %v1780_v19 = vadd.f32 %v2359_v25, %v2849_v35  ;;  %v562_v35 = vmul.f32 %v3019_v58, %v3019_v58 }
 0x1f9   :  { %v1185_v26 = vpop.f32.mrf.mxu1 }
 0x1fa   :  { %1912 = vst [vmem:[%s3613_s4 + $0x50] sm:$0xff] %v1848_v32  ;;  %v1851_v33 = vadd.f32 %v3277_v3, %v1780_v19  ;;  %v1779_v44 = vadd.f32 %v1185_v26, %v2851_v36  ;;  %v1719_v28 = vmul.f32 %v2864_v40, %v562_v35 }
 0x1fb   :  { %v2362_v55 = vpop.f32.mrf.mxu1 }
 0x1fc   :  { %1915 = vst [vmem:[%s3613_s4 + $0x68] sm:$0xff] %v1851_v33  ;;  %v1850_v34 = vadd.f32 %v3277_v3, %v1779_v44  ;;  %v1782_v1 = vadd.f32 %v2362_v55, %v2853_v37 }
 0x1fd   :  { %v1195_v7 = vpop.f32.mrf.mxu1 }
 0x1fe   :  { %1914 = vst [vmem:[%s3613_s4 + $0x60] sm:$0xff] %v1850_v34  ;;  %v1853_v17 = vadd.f32 %v3277_v3, %v1782_v1  ;;  %v1781_v36 = vadd.f32 %v1195_v7, %v2856_v38 }
 0x1ff   :  { %v2397_v27 = vpop.f32.mrf.mxu1 }
 0x200   :  { %1917 = vst [vmem:[%s3613_s4 + $0x78] sm:$0xff] %v1853_v17  ;;  %v1852_v2 = vadd.f32 %v3277_v3, %v1781_v36  ;;  %v1784_v37 = vadd.f32 %v2397_v27, %v2860_v39 }
 0x201   :  { %v1270_v20 = vpop.f32.mrf.mxu1 }
 0x202   :  { %1916 = vst [vmem:[%s3613_s4 + $0x70] sm:$0xff] %v1852_v2  ;;  %v1855_v6 = vadd.f32 %v3277_v3, %v1784_v37  ;;  %v1655_v38 = vmul.f32 %v3019_v58, %v1270_v20 }
 0x203   :  { %v2400_v15 = vpop.f32.mrf.mxu1 }
 0x204   :  { %1919 = vst [vmem:[%s3613_s4 + $0x88] sm:$0xff] %v1855_v6  ;;  %v1783_v29 = vadd.f32 %v1719_v28, %v1655_v38  ;;  %v1786_v16 = vadd.f32 %v2400_v15, %v2868_v42 }
 0x205   :  { %v1280_v39 = vpop.f32.mrf.mxu1 }
 0x206   :  { %v1854_v23 = vadd.f32 %v3277_v3, %v1783_v29  ;;  %v1857_v40 = vadd.f32 %v3277_v3, %v1786_v16  ;;  %v1785_v30 = vadd.f32 %v1280_v39, %v2872_v43 }
 0x207   :  { %v2403_v21 = vpop.f32.mrf.mxu1 }
 0x208   :  { %1918 = vst [vmem:[%s3613_s4 + $0x80] sm:$0xff] %v1854_v23  ;;  %1921 = vst [vmem:[%s3613_s4 + $0x98] sm:$0xff] %v1857_v40  ;;  %v1856_v58 = vadd.f32 %v3277_v3, %v1785_v30  ;;  %v1788_v42 = vadd.f32 %v2403_v21, %v2876_v45 }
 0x209   :  { %v1290_v24 = vpop.f32.mrf.mxu1 }
 0x20a   :  { %1920 = vst [vmem:[%s3613_s4 + $0x90] sm:$0xff] %v1856_v58  ;;  %v1859_v43 = vadd.f32 %v3277_v3, %v1788_v42  ;;  %v1787_v31 = vadd.f32 %v1290_v24, %v2880_v46 }
 0x20b   :  { %v2406_v53 = vpop.f32.mrf.mxu1 }
 0x20c   :  { %1923 = vst [vmem:[%s3613_s4 + $0xa8] sm:$0xff] %v1859_v43  ;;  %v1858_v25 = vadd.f32 %v3277_v3, %v1787_v31  ;;  %v1790_v32 = vadd.f32 %v2406_v53, %v2884_v47 }
 0x20d   :  { %v1300_v19 = vpop.f32.mrf.mxu1 }
 0x20e   :  { %1922 = vst [vmem:[%s3613_s4 + $0xa0] sm:$0xff] %v1858_v25  ;;  %v1861_v45 = vadd.f32 %v3277_v3, %v1790_v32  ;;  %v1789_v26 = vadd.f32 %v1300_v19, %v2888_v48 }
 0x20f   :  { %v2409_v33 = vpop.f32.mrf.mxu1 }
 0x210   :  { %1925 = vst [vmem:[%s3613_s4 + $0xb8] sm:$0xff] %v1861_v45  ;;  %v1860_v46 = vadd.f32 %v3277_v3, %v1789_v26  ;;  %v1792_v44 = vadd.f32 %v2409_v33, %v2892_v49  ;;  %v3648_v45 = vld [vmem:[#allocation2_spill] sm:$0xff] }
 0x211   :  { %v1310_v55 = vpop.f32.mrf.mxu1 }
 0x212   :  { %1924 = vst [vmem:[%s3613_s4 + $0xb0] sm:$0xff] %v1860_v46  ;;  %v1863_v47 = vadd.f32 %v3277_v3, %v1792_v44  ;;  %v1791_v34 = vadd.f32 %v1310_v55, %v2896_v50  ;;  %v3649_v46 = vld [vmem:[#allocation3_spill] sm:$0xff] }
 0x213   :  { %v2412_v1 = vpop.f32.mrf.mxu1 }
 0x214   :  { %1927 = vst [vmem:[%s3613_s4 + $0xc8] sm:$0xff] %v1863_v47  ;;  %v1862_v48 = vadd.f32 %v3277_v3, %v1791_v34  ;;  %v1794_v7 = vadd.f32 %v2412_v1, %v2900_v51  ;;  %v3650_v47 = vld [vmem:[#allocation4_spill] sm:$0xff] }
 0x215   :  { %v1320_v35 = vpop.f32.mrf.mxu1 }
 0x216   :  { %1926 = vst [vmem:[%s3613_s4 + $0xc0] sm:$0xff] %v1862_v48  ;;  %v1865_v49 = vadd.f32 %v3277_v3, %v1794_v7  ;;  %v1793_v17 = vadd.f32 %v1320_v35, %v2904_v52  ;;  %v3651_v7 = vld [vmem:[#allocation5_spill] sm:$0xff] }
 0x217   :  { %v2415_v36 = vpop.f32.mrf.mxu1 }
 0x218   :  { %1929 = vst [vmem:[%s3613_s4 + $0xd8] sm:$0xff] %v1865_v49  ;;  %v1864_v50 = vadd.f32 %v3277_v3, %v1793_v17  ;;  %v1796_v27 = vadd.f32 %v2415_v36, %v2910_v54  ;;  %v578_v54 = vmul.f32 %v3131_v61, %v3131_v61  ;;  %v3652_v36 = vld [vmem:[#allocation6_spill] sm:$0xff] }
 0x219   :  { %v1330_v2 = vpop.f32.mrf.mxu1 }
 0x21a   :  { %1928 = vst [vmem:[%s3613_s4 + $0xd0] sm:$0xff] %v1864_v50  ;;  %v1867_v51 = vadd.f32 %v3277_v3, %v1796_v27  ;;  %v1795_v37 = vadd.f32 %v1330_v2, %v2916_v56  ;;  %v1735_v39 = vmul.f32 %v2942_v0, %v578_v54 }
 0x21b   :  { %v2418_v20 = vpop.f32.mrf.mxu1 }
 0x21c   :  { %1931 = vst [vmem:[%s3613_s4 + $0xe8] sm:$0xff] %v1867_v51  ;;  %v1866_v52 = vadd.f32 %v3277_v3, %v1795_v37  ;;  %v1798_v28 = vadd.f32 %v2418_v20, %v2925_v59  ;;  %v3653_v51 = vld [vmem:[#allocation7_spill] sm:$0xff] }
 0x21d   :  { %v1340_v6 = vpop.f32.mrf.mxu1 }
 0x21e   :  { %1930 = vst [vmem:[%s3613_s4 + $0xe0] sm:$0xff] %v1866_v52  ;;  %v1869_v38 = vadd.f32 %v3277_v3, %v1798_v28  ;;  %v1797_v56 = vadd.f32 %v1340_v6, %v2928_v60  ;;  %v3654_v28 = vld [vmem:[#allocation8_spill] sm:$0xff] }
 0x21f   :  { %v2453_v15 = vpop.f32.mrf.mxu1 }
 0x220   :  { %1933 = vst [vmem:[%s3613_s4 + $0xf8] sm:$0xff] %v1869_v38  ;;  %v1868_v29 = vadd.f32 %v3277_v3, %v1797_v56  ;;  %v1800_v59 = vadd.f32 %v2453_v15, %v2938_v63  ;;  %v3655_v56 = vld [vmem:[#allocation9_spill] sm:$0xff] }
 0x221   :  { %v1415_v16 = vpop.f32.mrf.mxu1 }
 0x222   :  { %1932 = vst [vmem:[%s3613_s4 + $0xf0] sm:$0xff] %v1868_v29  ;;  %v1871_v23 = vadd.f32 %v3277_v3, %v1800_v59  ;;  %v1671_v60 = vmul.f32 %v3131_v61, %v1415_v16  ;;  %v594_v59 = vmul.f32 %v3219_v18, %v3219_v18 }
 0x223   :  { %v2456_v40 = vpop.f32.mrf.mxu1 }
 0x224   :  { %1935 = vst [vmem:[%s3613_s4 + $0x108] sm:$0xff] %v1871_v23  ;;  %v1799_v30 = vadd.f32 %v1735_v39, %v1671_v60  ;;  %v1802_v21 = vadd.f32 %v2456_v40, %v2952_v4  ;;  %v3656_v39 = vld [vmem:[#allocation10_spill] sm:$0xff] }
 0x225   :  { %v1425_v63 = vpop.f32.mrf.mxu1 }
 0x226   :  { %v1870_v58 = vadd.f32 %v3277_v3, %v1799_v30  ;;  %v1873_v0 = vadd.f32 %v3277_v3, %v1802_v21  ;;  %v1801_v42 = vadd.f32 %v1425_v63, %v2956_v5  ;;  %v1751_v63 = vmul.f32 %v3054_v13, %v594_v59 }
 0x227   :  { %v2459_v24 = vpop.f32.mrf.mxu1 }
 0x228   :  { %1934 = vst [vmem:[%s3613_s4 + $0x100] sm:$0xff] %v1870_v58  ;;  %1937 = vst [vmem:[%s3613_s4 + $0x118] sm:$0xff] %v1873_v0  ;;  %v1872_v61 = vadd.f32 %v3277_v3, %v1801_v42  ;;  %v1804_v4 = vadd.f32 %v2459_v24, %v2966_v9 }
 0x229   :  { %v1435_v43 = vpop.f32.mrf.mxu1 }
 0x22a   :  { %1936 = vst [vmem:[%s3613_s4 + $0x110] sm:$0xff] %v1872_v61  ;;  %v1875_v5 = vadd.f32 %v3277_v3, %v1804_v4  ;;  %v1803_v31 = vadd.f32 %v1435_v43, %v2970_v10 }
 0x22b   :  { %v2462_v53 = vpop.f32.mrf.mxu1 }
 0x22c   :  { %1939 = vst [vmem:[%s3613_s4 + $0x128] sm:$0xff] %v1875_v5  ;;  %v1874_v25 = vadd.f32 %v3277_v3, %v1803_v31  ;;  %v1806_v32 = vadd.f32 %v2462_v53, %v2980_v14 }
 0x22d   :  { %v1445_v19 = vpop.f32.mrf.mxu1 }
 0x22e   :  { %1938 = vst [vmem:[%s3613_s4 + $0x120] sm:$0xff] %v1874_v25  ;;  %v1877_v9 = vadd.f32 %v3277_v3, %v1806_v32  ;;  %v1805_v26 = vadd.f32 %v1445_v19, %v3648_v45 }
 0x22f   :  { %v2465_v33 = vpop.f32.mrf.mxu1 }
 0x230   :  { %1941 = vst [vmem:[%s3613_s4 + $0x138] sm:$0xff] %v1877_v9  ;;  %v1876_v10 = vadd.f32 %v3277_v3, %v1805_v26  ;;  %v1808_v44 = vadd.f32 %v2465_v33, %v3649_v46  ;;  %v3657_v33 = vld [vmem:[#allocation11_spill] sm:$0xff] }
 0x231   :  { %v1455_v55 = vpop.f32.mrf.mxu1 }
 0x232   :  { %1940 = vst [vmem:[%s3613_s4 + $0x130] sm:$0xff] %v1876_v10  ;;  %v1879_v14 = vadd.f32 %v3277_v3, %v1808_v44  ;;  %v1807_v34 = vadd.f32 %v1455_v55, %v3650_v47  ;;  %v3658_v44 = vld [vmem:[#allocation12_spill] sm:$0xff]  ;;  %v3659_v47 = vld [vmem:[#allocation13_spill] sm:$0xff] }
 0x233   :  { %v2468_v1 = vpop.f32.mrf.mxu1 }
 0x234   :  { %1943 = vst [vmem:[%s3613_s4 + $0x148] sm:$0xff] %v1879_v14  ;;  %v1878_v48 = vadd.f32 %v3277_v3, %v1807_v34  ;;  %v1810_v35 = vadd.f32 %v2468_v1, %v3651_v7  ;;  %v3660_v7 = vld [vmem:[#allocation14_spill] sm:$0xff] }
 0x235   :  { %v1465_v49 = vpop.f32.mrf.mxu1 }
 0x236   :  { %1942 = vst [vmem:[%s3613_s4 + $0x140] sm:$0xff] %v1878_v48  ;;  %v1881_v17 = vadd.f32 %v3277_v3, %v1810_v35  ;;  %v1809_v50 = vadd.f32 %v1465_v49, %v3652_v36  ;;  %v3661_v36 = vld [vmem:[#allocation15_spill] sm:$0xff] }
 0x237   :  { %v2471_v27 = vpop.f32.mrf.mxu1 }
 0x238   :  { %1945 = vst [vmem:[%s3613_s4 + $0x158] sm:$0xff] %v1881_v17  ;;  %v1880_v2 = vadd.f32 %v3277_v3, %v1809_v50  ;;  %v1812_v37 = vadd.f32 %v2471_v27, %v3653_v51  ;;  %v3662_v51 = vld [vmem:[#allocation16_spill] sm:$0xff] }
 0x239   :  { %v1475_v20 = vpop.f32.mrf.mxu1 }
 0x23a   :  { %1944 = vst [vmem:[%s3613_s4 + $0x150] sm:$0xff] %v1880_v2  ;;  %v1883_v52 = vadd.f32 %v3277_v3, %v1812_v37  ;;  %v1811_v6 = vadd.f32 %v1475_v20, %v3654_v28  ;;  %v3663_v28 = vld [vmem:[#allocation17_spill] sm:$0xff] }
 0x23b   :  { %v2474_v54 = vpop.f32.mrf.mxu1 }
 0x23c   :  { %1947 = vst [vmem:[%s3613_s4 + $0x168] sm:$0xff] %v1883_v52  ;;  %v1882_v38 = vadd.f32 %v3277_v3, %v1811_v6  ;;  %v1814_v15 = vadd.f32 %v2474_v54, %v3655_v56  ;;  %v3664_v56 = vld [vmem:[#allocation18_spill] sm:$0xff] }
 0x23d   :  { %v1485_v29 = vpop.f32.mrf.mxu1 }
 0x23e   :  { %1946 = vst [vmem:[%s3613_s4 + $0x160] sm:$0xff] %v1882_v38  ;;  %v1885_v16 = vadd.f32 %v3277_v3, %v1814_v15  ;;  %v1813_v23 = vadd.f32 %v1485_v29, %v3656_v39 }
 0x23f   :  { %v2509_v60 = vpop.f32.mrf.mxu1 }
 0x240   :  { %1949 = vst [vmem:[%s3613_s4 + $0x178] sm:$0xff] %v1885_v16  ;;  %v1884_v40 = vadd.f32 %v3277_v3, %v1813_v23  ;;  %v1816_v30 = vadd.f32 %v2509_v60, %v3050_v11 }
 0x241   :  { %v1560_v21 = vpop.f32.mrf.mxu1 }
 0x242   :  { %1948 = vst [vmem:[%s3613_s4 + $0x170] sm:$0xff] %v1884_v40  ;;  %v1887_v58 = vadd.f32 %v3277_v3, %v1816_v30  ;;  %v1687_v0 = vmul.f32 %v3219_v18, %v1560_v21 }
 0x243   :  { %v2512_v42 = vpop.f32.mrf.mxu1 }
 0x244   :  { %1951 = vst [vmem:[%s3613_s4 + $0x188] sm:$0xff] %v1887_v58  ;;  %v1815_v24 = vadd.f32 %v1751_v63, %v1687_v0  ;;  %v1818_v61 = vadd.f32 %v2512_v42, %v3064_v41 }
 0x245   :  { %v1570_v11 = vpop.f32.mrf.mxu1 }
 0x246   :  { %v1886_v4 = vadd.f32 %v3277_v3, %v1815_v24  ;;  %v1889_v13 = vadd.f32 %v3277_v3, %v1818_v61  ;;  %v1817_v43 = vadd.f32 %v1570_v11, %v3068_v57 }
 0x247   :  { %v2515_v5 = vpop.f32.mrf.mxu1 }
 0x248   :  { %1950 = vst [vmem:[%s3613_s4 + $0x180] sm:$0xff] %v1886_v4  ;;  %1953 = vst [vmem:[%s3613_s4 + $0x198] sm:$0xff] %v1889_v13  ;;  %v1888_v18 = vadd.f32 %v3277_v3, %v1817_v43  ;;  %v1820_v41 = vadd.f32 %v2515_v5, %v3078_v12 }
 0x249   :  { %v1580_v31 = vpop.f32.mrf.mxu1 }
 0x24a   :  { %1952 = vst [vmem:[%s3613_s4 + $0x190] sm:$0xff] %v1888_v18  ;;  %v1891_v57 = vadd.f32 %v3277_v3, %v1820_v41  ;;  %v1819_v53 = vadd.f32 %v1580_v31, %v3082_v8 }
 0x24b   :  { %v2518_v25 = vpop.f32.mrf.mxu1 }
 0x24c   :  { %1955 = vst [vmem:[%s3613_s4 + $0x1a8] sm:$0xff] %v1891_v57  ;;  %v1890_v32 = vadd.f32 %v3277_v3, %v1819_v53  ;;  %v1822_v19 = vadd.f32 %v2518_v25, %v3092_v22 }
 0x24d   :  { %v1590_v9 = vpop.f32.mrf.mxu1 }
 0x24e   :  { %1954 = vst [vmem:[%s3613_s4 + $0x1a0] sm:$0xff] %v1890_v32  ;;  %v1893_v12 = vadd.f32 %v3277_v3, %v1822_v19  ;;  %v1821_v45 = vadd.f32 %v1590_v9, %v3096_v62 }
 0x24f   :  { %v2521_v26 = vpop.f32.mrf.mxu1 }
 0x250   :  { %1957 = vst [vmem:[%s3613_s4 + $0x1b8] sm:$0xff] %v1893_v12  ;;  %v1892_v8 = vadd.f32 %v3277_v3, %v1821_v45  ;;  %v1824_v10 = vadd.f32 %v2521_v26, %v3657_v33 }
 0x251   :  { %v1600_v46 = vpop.f32.mrf.mxu1 }
 0x252   :  { %1956 = vst [vmem:[%s3613_s4 + $0x1b0] sm:$0xff] %v1892_v8  ;;  %v1895_v22 = vadd.f32 %v3277_v3, %v1824_v10  ;;  %v1823_v55 = vadd.f32 %v1600_v46, %v3658_v44 }
 0x253   :  { %v2524_v14 = vpop.f32.mrf.mxu1 }
 0x254   :  { %1959 = vst [vmem:[%s3613_s4 + $0x1c8] sm:$0xff] %v1895_v22  ;;  %v1894_v62 = vadd.f32 %v3277_v3, %v1823_v55  ;;  %v1826_v34 = vadd.f32 %v2524_v14, %v3659_v47 }
 0x255   :  { %v1610_v1 = vpop.f32.mrf.mxu1 }
 0x256   :  { %1958 = vst [vmem:[%s3613_s4 + $0x1c0] sm:$0xff] %v1894_v62  ;;  %v1897_v48 = vadd.f32 %v3277_v3, %v1826_v34  ;;  %v1825_v35 = vadd.f32 %v1610_v1, %v3660_v7 }
 0x257   :  { %v2527_v49 = vpop.f32.mrf.mxu1 }
 0x258   :  { %1961 = vst [vmem:[%s3613_s4 + $0x1d8] sm:$0xff] %v1897_v48  ;;  %v1896_v17 = vadd.f32 %v3277_v3, %v1825_v35  ;;  %v1828_v50 = vadd.f32 %v2527_v49, %v3661_v36 }
 0x259   :  { %v1620_v27 = vpop.f32.mrf.mxu1 }
 0x25a   :  { %1960 = vst [vmem:[%s3613_s4 + $0x1d0] sm:$0xff] %v1896_v17  ;;  %v1899_v2 = vadd.f32 %v3277_v3, %v1828_v50  ;;  %v1827_v37 = vadd.f32 %v1620_v27, %v3662_v51 }
 0x25b   :  { %v2530_v20 = vpop.f32.mrf.mxu1 }
 0x25c   :  { %1963 = vst [vmem:[%s3613_s4 + $0x1e8] sm:$0xff] %v1899_v2  ;;  %v1898_v52 = vadd.f32 %v3277_v3, %v1827_v37  ;;  %v1830_v6 = vadd.f32 %v2530_v20, %v3663_v28 }
 0x25d   :  { %v1630_v54 = vpop.f32.mrf.mxu1 }
 0x25e   :  { %1962 = vst [vmem:[%s3613_s4 + $0x1e0] sm:$0xff] %v1898_v52  ;;  %v1901_v38 = vadd.f32 %v3277_v3, %v1830_v6  ;;  %v1829_v15 = vadd.f32 %v1630_v54, %v3664_v56 }
 0x260   :  { %1965 = vst [vmem:[%s3613_s4 + $0x1f8] sm:$0xff] %v1901_v38  ;;  %v1900_v29 = vadd.f32 %v3277_v3, %v1829_v15 }
 0x262   :  { %1964 = vst [vmem:[%s3613_s4 + $0x1f0] sm:$0xff] %v1900_v29 }

</bundles_post_ra>
